<compile_context>
chip_gen: v7x
topology: tpu7x:2x2x1
jax: 0.10.0
libtpu: 0.0.40
codegen_flags: <defaults>
</compile_context>

<pallas_src>
import functools

import jax
import jax.numpy as jnp
from jax.experimental import pallas as pl
from jax.experimental.pallas import tpu as pltpu

IN_DIM = 27
H1_DIM = 128
H2_DIM = 64
OUT_DIM = 9
PAD = 128  # lane-dense padded width for hidden-2 / output


def _round_up(n: int, m: int) -> int:
    return ((n + m - 1) // m) * m


def _pad_to(a, shape):
    pads = [(0, t - s) for s, t in zip(a.shape, shape)]
    return jnp.pad(a, pads)


def _mlp_kernel(x_ref, w1_ref, b1_ref, w2_ref, b2_ref, w3_ref, b3_ref, o_ref):
    # x tile: (TM, 27); weights resident across grid steps.
    x = x_ref[...]
    h1 = jnp.dot(x, w1_ref[...], preferred_element_type=jnp.float32)
    h1 = jnp.maximum(h1 + b1_ref[...], 0.0)                        # (TM, 128) f32

    h1 = h1.astype(w2_ref.dtype)
    h2 = jnp.dot(h1, w2_ref[...], preferred_element_type=jnp.float32)
    h2 = jnp.maximum(h2 + b2_ref[...], 0.0)                        # (TM, 128) f32 (cols 64..127 are 0)

    h2 = h2.astype(w3_ref.dtype)
    o = jnp.dot(h2, w3_ref[...], preferred_element_type=jnp.float32)
    o_ref[...] = o + b3_ref[...]                                   # (TM, 128), cols 9..127 are 0


def prepare_params(params, use_bf16: bool = False):
    """Pad weights/biases to lane-dense (multiple-of-128) widths; optionally cast to bf16."""
    w1, b1, w2, b2, w3, b3 = params
    w2p = _pad_to(w2, (H1_DIM, PAD))          # (128, 64)  -> (128, 128)
    b2p = _pad_to(b2, (1, PAD))               # (1, 64)    -> (1, 128)
    w3p = _pad_to(w3, (PAD, PAD))             # (64, 9)    -> (128, 128) (zero rows/cols)
    b3p = _pad_to(b3, (1, PAD))               # (1, 9)     -> (1, 128)
    wdt = jnp.bfloat16 if use_bf16 else jnp.float32
    # Biases stay f32 (added after f32 accumulation).
    return (w1.astype(wdt), b1.astype(jnp.float32),
            w2p.astype(wdt), b2p.astype(jnp.float32),
            w3p.astype(wdt), b3p.astype(jnpp_f32 := jnp.float32))


@functools.partial(jax.jit, static_argnames=("block_rows", "use_bf16"))
def tictactoe_nn_forward(x, params, *, block_rows: int = 512, use_bf16: bool = False):
    """x: (B, 27) float32 -> logits (B, 9) float32."""
    w1, b1, w2p, b2p, w3p, b3p = prepare_params(params, use_bf16=use_bf16)

    B = x.shape[0]
    # Batch tile: multiple of 8 sublanes, capped by block_rows (VMEM-bounded).
    tm = min(block_rows, _round_up(B, 8))
    b_pad = _round_up(B, tm)
    grid = (b_pad // tm,)

    xin = x.astype(jnp.bfloat16 if use_bf16 else jnp.float32)
    if b_pad != B:
        xin = jnp.pad(xin, ((0, b_pad - B), (0, 0)))

    out_padded = pl.pallas_call(
        _mlp_kernel,
        out_shape=jax.ShapeDtypeStruct((b_pad, PAD), jnp.float32),
        grid=grid,
        in_specs=[
            pl.BlockSpec((tm, IN_DIM), lambda i: (i, 0)),      # x tile (streamed)
            pl.BlockSpec((IN_DIM, H1_DIM), lambda i: (0, 0)),  # w1 (resident)
            pl.BlockSpec((1, H1_DIM), lambda i: (0, 0)),       # b1
            pl.BlockSpec((H1_DIM, PAD), lambda i: (0, 0)),     # w2 (padded)
            pl.BlockSpec((1, PAD), lambda i: (0, 0)),          # b2
            pl.BlockSpec((PAD, PAD), lambda i: (0, 0)),        # w3 (padded)
            pl.BlockSpec((1, PAD), lambda i: (0, 0)),          # b3
        ],
        out_specs=pl.BlockSpec((tm, PAD), lambda i: (i, 0)),   # lane-dense output tile
        compiler_params=pltpu.CompilerParams(
            dimension_semantics=("parallel",)),                # v7x: shard batch over 2 TCs
    )(xin, w1, b1, w2p, b2p, w3p, b3p)

    return out_padded[:B, :OUT_DIM]


def init_params(key):
    """Deterministic init mimicking PyTorch Linear default (U(-k, k), k=1/sqrt(fan_in)).

    Weights stored as (in_features, out_features) so y = x @ W + b == PyTorch x @ W.T + b.
    """
    dims = [(IN_DIM, H1_DIM), (H1_DIM, H2_DIM), (H2_DIM, OUT_DIM)]
    params = []
    for fan_in, fan_out in dims:
        key, kw, kb = jax.random.split(key, 3)
        bound = 1.0 / jnp.sqrt(float(fan_in))
        w = jax.random.uniform(kw, (fan_in, fan_out), jnp.float32, -bound, bound)
        b = jax.random.uniform(kb, (1, fan_out), jnp.float32, -bound, bound)
        params += [w, b]
    return tuple(params)


def reference_forward(x, params):
    w1, b1, w2, b2, w3, b3 = params
    h1 = jnp.maximum(x @ w1 + b1, 0.0)
    h2 = jnp.maximum(h1 @ w2 + b2, 0.0)
    return h2 @ w3 + b3


if __name__ == "__main__":
    key = jax.random.PRNGKey(0)
    key, kparam, kx1, kx2 = jax.random.split(key, 4)

    params = init_params(kparam)

    # --- small batch (matches typical usage): 8 one-hot-encoded boards -------
    B = 8
    cells = jax.random.randint(kx1, (B, 9), 0, 3)                # 0=empty,1=X,2=O
    x = jax.nn.one_hot(cells, 3, dtype=jnp.float32).reshape(B, IN_DIM)

    out = tictactoe_nn_forward(x, params)
    out = jax.block_until_ready(out)
    ref = reference_forward(x, params)
    assert out.shape == (B, OUT_DIM)
    assert jnp.allclose(out, ref, atol=1e-4, rtol=1e-5), float(jnp.max(jnp.abs(out - ref)))

    # --- larger, non-multiple batch: exercises batch tiling + padding --------
    B2 = 300
    cells2 = jax.random.randint(kx2, (B2, 9), 0, 3)
    x2 = jax.nn.one_hot(cells2, 3, dtype=jnp.float32).reshape(B2, IN_DIM)

    out2 = tictactoe_nn_forward(x2, params, block_rows=128)      # grid = (3,)
    out2 = jax.block_until_ready(out2)
    ref2 = reference_forward(x2, params)
    assert out2.shape == (B2, OUT_DIM)
    assert jnp.allclose(out2, ref2, atol=1e-4, rtol=1e-5), float(jnp.max(jnp.abs(out2 - ref2)))

    # --- bf16-streaming variant (v6e/v7x bandwidth path); loose tolerance ----
    out_bf16 = tictactoe_nn_forward(x2, params, block_rows=128, use_bf16=True)
    out_bf16 = jax.block_until_ready(out_bf16)
    assert out_bf16.shape == (B2, OUT_DIM)
    assert float(jnp.max(jnp.abs(out_bf16 - ref2))) < 5e-2

    print("KERNEL_OK")
</pallas_src>

<mosaic_0001>
module attributes {stable_mosaic.version = 11 : i64} {
  func.func @_mlp_kernel(%arg0: i32, %arg1: memref<8x27xf32, #tpu.memory_space<vmem>>, %arg2: memref<27x128xf32, #tpu.memory_space<vmem>>, %arg3: memref<1x128xf32, #tpu.memory_space<vmem>>, %arg4: memref<128x128xf32, #tpu.memory_space<vmem>>, %arg5: memref<1x128xf32, #tpu.memory_space<vmem>>, %arg6: memref<128x128xf32, #tpu.memory_space<vmem>>, %arg7: memref<1x128xf32, #tpu.memory_space<vmem>>, %arg8: memref<8x128xf32, #tpu.memory_space<vmem>>) attributes {dimension_semantics = [#tpu.dimension_semantics<parallel>], iteration_bounds = array<i64: 1>, scalar_prefetch = 0 : i64, scratch_operands = 0 : i64, tpu.core_type = #tpu.core_type<tc>, window_params = [{transform_indices = @transform_0, window_bounds = array<i64: 8, 27>}, {pipeline_mode = #tpu.pipeline_mode<synchronous>, transform_indices = @transform_1, window_bounds = array<i64: 27, 128>}, {pipeline_mode = #tpu.pipeline_mode<synchronous>, transform_indices = @transform_2, window_bounds = array<i64: 1, 128>}, {pipeline_mode = #tpu.pipeline_mode<synchronous>, transform_indices = @transform_3, window_bounds = array<i64: 128, 128>}, {pipeline_mode = #tpu.pipeline_mode<synchronous>, transform_indices = @transform_4, window_bounds = array<i64: 1, 128>}, {pipeline_mode = #tpu.pipeline_mode<synchronous>, transform_indices = @transform_5, window_bounds = array<i64: 128, 128>}, {pipeline_mode = #tpu.pipeline_mode<synchronous>, transform_indices = @transform_6, window_bounds = array<i64: 1, 128>}, {transform_indices = @transform_7, window_bounds = array<i64: 8, 128>}]} {
    %c0 = arith.constant 0 : index
    %c0_0 = arith.constant 0 : index
    %0 = vector.load %arg1[%c0, %c0_0] : memref<8x27xf32, #tpu.memory_space<vmem>>, vector<8x27xf32>
    %c0_1 = arith.constant 0 : index
    %c0_2 = arith.constant 0 : index
    %1 = vector.load %arg2[%c0_1, %c0_2] : memref<27x128xf32, #tpu.memory_space<vmem>>, vector<27x128xf32>
    %cst = arith.constant dense<0.000000e+00> : vector<8x128xf32>
    %2 = tpu.matmul %0, %1, %cst {dimension_numbers = #tpu.dot_dimension_numbers<[1], [0], [0], [1], [0, 0, 1, 1], [], []>} : vector<8x27xf32>, vector<27x128xf32>, vector<8x128xf32> -> vector<8x128xf32>
    %c0_3 = arith.constant 0 : index
    %c0_4 = arith.constant 0 : index
    %3 = vector.load %arg3[%c0_3, %c0_4] : memref<1x128xf32, #tpu.memory_space<vmem>>, vector<1x128xf32>
    %4 = vector.broadcast %3 : vector<1x128xf32> to vector<8x128xf32>
    %5 = arith.addf %2, %4 : vector<8x128xf32>
    %cst_5 = arith.constant 0.000000e+00 : f32
    %6 = vector.broadcast %cst_5 : f32 to vector<8x128xf32>
    %7 = arith.maximumf %5, %6 : vector<8x128xf32>
    %c0_6 = arith.constant 0 : index
    %c0_7 = arith.constant 0 : index
    %8 = vector.load %arg4[%c0_6, %c0_7] : memref<128x128xf32, #tpu.memory_space<vmem>>, vector<128x128xf32>
    %cst_8 = arith.constant dense<0.000000e+00> : vector<8x128xf32>
    %9 = tpu.matmul %7, %8, %cst_8 {dimension_numbers = #tpu.dot_dimension_numbers<[1], [0], [0], [1], [0, 0, 1, 1], [], []>} : vector<8x128xf32>, vector<128x128xf32>, vector<8x128xf32> -> vector<8x128xf32>
    %c0_9 = arith.constant 0 : index
    %c0_10 = arith.constant 0 : index
    %10 = vector.load %arg5[%c0_9, %c0_10] : memref<1x128xf32, #tpu.memory_space<vmem>>, vector<1x128xf32>
    %11 = vector.broadcast %10 : vector<1x128xf32> to vector<8x128xf32>
    %12 = arith.addf %9, %11 : vector<8x128xf32>
    %cst_11 = arith.constant 0.000000e+00 : f32
    %13 = vector.broadcast %cst_11 : f32 to vector<8x128xf32>
    %14 = arith.maximumf %12, %13 : vector<8x128xf32>
    %c0_12 = arith.constant 0 : index
    %c0_13 = arith.constant 0 : index
    %15 = vector.load %arg6[%c0_12, %c0_13] : memref<128x128xf32, #tpu.memory_space<vmem>>, vector<128x128xf32>
    %cst_14 = arith.constant dense<0.000000e+00> : vector<8x128xf32>
    %16 = tpu.matmul %14, %15, %cst_14 {dimension_numbers = #tpu.dot_dimension_numbers<[1], [0], [0], [1], [0, 0, 1, 1], [], []>} : vector<8x128xf32>, vector<128x128xf32>, vector<8x128xf32> -> vector<8x128xf32>
    %c0_15 = arith.constant 0 : index
    %c0_16 = arith.constant 0 : index
    %17 = vector.load %arg7[%c0_15, %c0_16] : memref<1x128xf32, #tpu.memory_space<vmem>>, vector<1x128xf32>
    %18 = vector.broadcast %17 : vector<1x128xf32> to vector<8x128xf32>
    %19 = arith.addf %16, %18 : vector<8x128xf32>
    %c0_17 = arith.constant 0 : index
    %c0_18 = arith.constant 0 : index
    %20 = vector.load %arg8[%c0_17, %c0_18] : memref<8x128xf32, #tpu.memory_space<vmem>>, vector<8x128xf32>
    tpu.vector_store %arg8[%c0_17, %c0_18], %19 {strides = array<i32>} : memref<8x128xf32, #tpu.memory_space<vmem>>, vector<8x128xf32>,
    return
  }
  func.func @transform_0(%arg0: i32) -> (i32, i32) {
    %c0_i32 = arith.constant 0 : i32
    %c0_i32_0 = arith.constant 0 : i32
    return %arg0, %c0_i32 : i32, i32
  }
  func.func @transform_1(%arg0: i32) -> (i32, i32) {
    %c0_i32 = arith.constant 0 : i32
    %c0_i32_0 = arith.constant 0 : i32
    %c0_i32_1 = arith.constant 0 : i32
    return %c0_i32, %c0_i32_0 : i32, i32
  }
  func.func @transform_2(%arg0: i32) -> (i32, i32) {
    %c0_i32 = arith.constant 0 : i32
    %c0_i32_0 = arith.constant 0 : i32
    %c0_i32_1 = arith.constant 0 : i32
    return %c0_i32, %c0_i32_0 : i32, i32
  }
  func.func @transform_3(%arg0: i32) -> (i32, i32) {
    %c0_i32 = arith.constant 0 : i32
    %c0_i32_0 = arith.constant 0 : i32
    %c0_i32_1 = arith.constant 0 : i32
    return %c0_i32, %c0_i32_0 : i32, i32
  }
  func.func @transform_4(%arg0: i32) -> (i32, i32) {
    %c0_i32 = arith.constant 0 : i32
    %c0_i32_0 = arith.constant 0 : i32
    %c0_i32_1 = arith.constant 0 : i32
    return %c0_i32, %c0_i32_0 : i32, i32
  }
  func.func @transform_5(%arg0: i32) -> (i32, i32) {
    %c0_i32 = arith.constant 0 : i32
    %c0_i32_0 = arith.constant 0 : i32
    %c0_i32_1 = arith.constant 0 : i32
    return %c0_i32, %c0_i32_0 : i32, i32
  }
  func.func @transform_6(%arg0: i32) -> (i32, i32) {
    %c0_i32 = arith.constant 0 : i32
    %c0_i32_0 = arith.constant 0 : i32
    %c0_i32_1 = arith.constant 0 : i32
    return %c0_i32, %c0_i32_0 : i32, i32
  }
  func.func @transform_7(%arg0: i32) -> (i32, i32) {
    %c0_i32 = arith.constant 0 : i32
    %c0_i32_0 = arith.constant 0 : i32
    return %arg0, %c0_i32 : i32, i32
  }
}

</mosaic_0001>

<bundles_post_ra>
// kernel: tictactoe_nn_forward.1
= control target key start
LH: loop header
LB: loop body
LE: loop exit
PB: predicated region body
PF: predicated region fallthrough
CT: control target
= control target key end

     0   :  { %vm43_vm0 = vcmask 1042432   ;;  %v529_v3 = vmov 0.0|0.0   ;;  %vm530_vm1 = vmmov 0   ;;  %v531_v6 = vmov 0.0   ;;  %s728_s0 = inlined_call_operand.vmem [shape: f32[8,27], index: 0, kind: input, shape index: {}]   ;;  %s729_s1 = inlined_call_operand.vmem [shape: f32[27,128], index: 1, kind: input, shape index: {}]   ;;  %s730_s2 = inlined_call_operand.vmem [shape: f32[1,128], index: 2, kind: input, shape index: {}]   ;;  %s731_s3 = inlined_call_operand.vmem [shape: f32[128,128], index: 3, kind: input, shape index: {}]   ;;  %s732_s4 = inlined_call_operand.vmem [shape: f32[1,128], index: 4, kind: input, shape index: {}]   ;;  %s733_s5 = inlined_call_operand.vmem [shape: f32[128,128], index: 5, kind: input, shape index: {}]   ;;  %s734_s6 = inlined_call_operand.vmem [shape: f32[1,128], index: 6, kind: input, shape index: {}]   ;;  %s735_s7 = inlined_call_operand.hbm [shape: f32[8,128], index: 7, kind: output, shape index: {}]  }
   0x1   :  { %v28_v0 = vld [vmem:[%s729_s1] sm:$0xff]  ;;  %v29_v1 = vld [vmem:[%s729_s1 + $0x8] sm:$0xff]  ;;  %v30_v2 = vld [vmem:[%s729_s1 + $0x10] sm:$0xff]  ;;  %445 = vmatprep.subr.bf16.mxu0 %v529_v3  ;;  %452 = vmatprep.subr.bf16.mxu1 %v529_v3  ;;  %vm532_vm2 = vmmov 1   ;;  %vm39_vm4 = vcmask 220160  }
   0x2   :  { %v446_v4 = vpack.c.bf16 %v29_v1, %v28_v0  ;;  %v31_v5 = vld [vmem:[%s729_s1 + $0x18] sm:$0x7]  ;;  %372 = vmatprep.mubr.msk.f32.mxu0 %vm530_vm1, %v531_v6  ;;  %v118_v7 = vld [vmem:[%s731_s3] sm:$0xff]  ;;  %v119_v8 = vld [vmem:[%s731_s3 + $0x8] sm:$0xff]  ;;  %407 = vmatprep.mubr.msk.f32.mxu1 %vm530_vm1, %v531_v6 }
   0x3   :  { %v120_v9 = vld [vmem:[%s731_s3 + $0x10] sm:$0xff]  ;;  %v449_v10 = vpack.c.bf16 %v31_v5, %v30_v2  ;;  %v453_v11 = vpack.c.bf16 %v119_v8, %v118_v7  ;;  %v121_v12 = vld [vmem:[%s731_s3 + $0x18] sm:$0xff]  ;;  %vm450_vm3 = vmpackc.low %vm43_vm0, %vm532_vm2 }
   0x4   :  { %447 = vmatpush3.bf16.msra.mxu0 %v446_v4  ;;  %v456_v13 = vpack.c.bf16 %v121_v12, %v120_v9  ;;  %v122_v14 = vld [vmem:[%s731_s3 + $0x20] sm:$0xff]  ;;  %v123_v15 = vld [vmem:[%s731_s3 + $0x28] sm:$0xff] }
   0x5   :  { %448 = vmatprep.subr.bf16.mxu0 %v529_v3  ;;  %454 = vmatpush3.bf16.msra.mxu1 %v453_v11  ;;  %v27_v16 = vld [vmem:[%s728_s0] sm:$0xff] }
   0x6   :  { %455 = vmatprep.subr.bf16.mxu1 %v529_v3 }
   0x8   :  { %451 = vmatpush3.bf16.msk.msra.mxu0 %vm450_vm3, %v449_v10 }
   0x9   :  { %12 = vsyncpa [#allocation3], 0  ;;  %476 = vmatprep.subr.bf16.mxu0 %v529_v3  ;;  %457 = vmatpush3.bf16.msra.mxu1 %v456_v13  ;;  %v459_v17 = vpack.c.bf16 %v123_v15, %v122_v14  ;;  %v124_v18 = vld [vmem:[%s731_s3 + $0x30] sm:$0xff]  ;;  %v125_v19 = vld [vmem:[%s731_s3 + $0x38] sm:$0xff]  ;;  %s533_s26 = smov [#allocation2]  }
   0xa   :  { %458 = vmatprep.subr.bf16.mxu1 %v529_v3  ;;  %v462_v20 = vpack.c.bf16 %v125_v19, %v124_v18  ;;  %v126_v21 = vld [vmem:[%s731_s3 + $0x40] sm:$0xff]  ;;  %v127_v22 = vld [vmem:[%s731_s3 + $0x48] sm:$0xff]  ;;  %v128_v24 = vld [vmem:[%s731_s3 + $0x50] sm:$0xff]  ;;  %s312_s27 = sshll.u32 %s533_s26, 4  ;;  %s313_s27 = int_to_ptr.vmem [resolvable:$true] %s312_s27 }
   0xb   :  { %373 = vmatmul.mubr.msk.f32.vlgmr.msra.gmra.mrb[0].mxu0 %vm39_vm4, %v27_v16  ;;  %v465_v23 = vpack.c.bf16 %v127_v22, %v126_v21  ;;  %v129_v25 = vld [vmem:[%s731_s3 + $0x58] sm:$0xff]  ;;  %v130_v27 = vld [vmem:[%s731_s3 + $0x60] sm:$0xff]  ;;  %v131_v28 = vld [vmem:[%s731_s3 + $0x68] sm:$0xff]  ;;  %p510_p1 = scmp.lt.s32.totalorder %s313_s27, %s313_s27 }
   0xc   :  { %442 = vmatprep.mubr.msk.f32.mxu0 %vm530_vm1, %v531_v6  ;;  %v468_v26 = vpack.c.bf16 %v129_v25, %v128_v24  ;;  %v471_v29 = vpack.c.bf16 %v131_v28, %v130_v27  ;;  %v132_v30 = vld [vmem:[%s731_s3 + $0x70] sm:$0xff]  ;;  %v133_v31 = vld [vmem:[%s731_s3 + $0x78] sm:$0xff]  ;;  %v212_v33 = vld [vmem:[%s733_s5] sm:$0xff] }
   0xd   :  { %460 = vmatpush3.bf16.msra.mxu1 %v459_v17  ;;  %v474_v32 = vpack.c.bf16 %v133_v31, %v132_v30  ;;  %v213_v34 = vld [vmem:[%s733_s5 + $0x8] sm:$0xff]  ;;  %v214_v35 = vld [vmem:[%s733_s5 + $0x10] sm:$0xff]  ;;  %v215_v37 = vld [vmem:[%s733_s5 + $0x18] sm:$0xff] }
   0xe   :  { %461 = vmatprep.subr.bf16.mxu1 %v529_v3  ;;  %v477_v36 = vpack.c.bf16 %v213_v34, %v212_v33  ;;  %v480_v38 = vpack.c.bf16 %v215_v37, %v214_v35  ;;  %v216_v39 = vld [vmem:[%s733_s5 + $0x20] sm:$0xff]  ;;  %v217_v40 = vld [vmem:[%s733_s5 + $0x28] sm:$0xff]  ;;  %v218_v42 = vld [vmem:[%s733_s5 + $0x30] sm:$0xff] }
   0xf   :  { %v483_v41 = vpack.c.bf16 %v217_v40, %v216_v39  ;;  %v219_v43 = vld [vmem:[%s733_s5 + $0x38] sm:$0xff]  ;;  %v220_v45 = vld [vmem:[%s733_s5 + $0x40] sm:$0xff]  ;;  %v221_v46 = vld [vmem:[%s733_s5 + $0x48] sm:$0xff] }
  0x10   :  { %478 = vmatpush3.bf16.msra.mxu0 %v477_v36  ;;  %v486_v44 = vpack.c.bf16 %v219_v43, %v218_v42  ;;  %v489_v47 = vpack.c.bf16 %v221_v46, %v220_v45  ;;  %v222_v48 = vld [vmem:[%s733_s5 + $0x50] sm:$0xff]  ;;  %v223_v49 = vld [vmem:[%s733_s5 + $0x58] sm:$0xff]  ;;  %v224_v51 = vld [vmem:[%s733_s5 + $0x60] sm:$0xff] }
  0x11   :  { %463 = vmatpush3.bf16.msra.mxu1 %v462_v20  ;;  %479 = vmatprep.subr.bf16.mxu0 %v529_v3  ;;  %v492_v50 = vpack.c.bf16 %v223_v49, %v222_v48  ;;  %v225_v52 = vld [vmem:[%s733_s5 + $0x68] sm:$0xff]  ;;  %v320_v54 = vld [vmem:[%s730_s2] ss:$0 sm:$0xff]  ;;  %v226_v59 = vld [vmem:[%s733_s5 + $0x70] sm:$0xff] }
  0x12   :  { %464 = vmatprep.subr.bf16.mxu1 %v529_v3  ;;  %v495_v53 = vpack.c.bf16 %v225_v52, %v224_v51  ;;  %v227_v60 = vld [vmem:[%s733_s5 + $0x78] sm:$0xff]  ;;  %v323_v62 = vld [vmem:[%s732_s4] ss:$0 sm:$0xff]  ;;  %s505_s5 = scalar_lea.vmem %s313_s27, 128 }
  0x13   :  { %v498_v61 = vpack.c.bf16 %v227_v60, %v226_v59  ;;  %p506_p0 = scmp.ne.s32.totalorder %s313_s27, %s505_s5  ;;  %p511_p2 = scmp.lt.s32.totalorder %s505_s5, %s505_s5 }
  0x14   :  { %481 = vmatpush3.bf16.msra.mxu0 %v480_v38 }
  0x15   :  { %466 = vmatpush3.bf16.msra.mxu1 %v465_v23  ;;  %482 = vmatprep.subr.bf16.mxu0 %v529_v3  ;;  %p512_p3 = por %p511_p2, %p510_p1 }
  0x16   :  { %467 = vmatprep.subr.bf16.mxu1 %v529_v3 }
  0x17   :  { %p513_p4 = pnand %p512_p3, %p506_p0 }
  0x18   :  { %484 = vmatpush3.bf16.msra.mxu0 %v483_v41 }
  0x19   :  { %469 = vmatpush3.bf16.msra.mxu1 %v468_v26  ;;  %485 = vmatprep.subr.bf16.mxu0 %v529_v3 }
  0x1a   :  { %470 = vmatprep.subr.bf16.mxu1 %v529_v3 }
  0x1c   :  { %487 = vmatpush3.bf16.msra.mxu0 %v486_v44 }
  0x1d   :  { %472 = vmatpush3.bf16.msra.mxu1 %v471_v29  ;;  %488 = vmatprep.subr.bf16.mxu0 %v529_v3 }
  0x1e   :  { %473 = vmatprep.subr.bf16.mxu1 %v529_v3 }
  0x20   :  { %490 = vmatpush3.bf16.msra.mxu0 %v489_v47 }
  0x21   :  { %475 = vmatpush3.bf16.msra.mxu1 %v474_v32  ;;  %491 = vmatprep.subr.bf16.mxu0 %v529_v3 }
  0x24   :  { %493 = vmatpush3.bf16.msra.mxu0 %v492_v50 }
  0x25   :  { %494 = vmatprep.subr.bf16.mxu0 %v529_v3 }
  0x28   :  { %496 = vmatpush3.bf16.msra.mxu0 %v495_v53 }
  0x29   :  { %497 = vmatprep.subr.bf16.mxu0 %v529_v3  ;;  %v324_v3 = vld [vmem:[%s734_s6] ss:$0 sm:$0xff] }
  0x2c   :  { %499 = vmatpush3.bf16.msra.mxu0 %v498_v61 }
  0xde   :  { %v113_v55 = vpop.f32.mrb[0].mxu0 }
  0xdf   :  { %v114_v56 = vadd.f32 %v320_v54, %v113_v55  ;;  %v374_v57 = vpop.f32.mrb[1].mxu0 }
  0xe1   :  { %v117_v58 = vmax.f32 %v114_v56, 0.0 }
  0xe3   :  { %408 = vmatmul.mubr.f32.vlgmr.msra.gmra.mrb[0].mxu1 %v117_v58 }
 0x1b6   :  { %v207_v63 = vpop.f32.mrb[0].mxu1 }
 0x1b7   :  { %v208_v0 = vadd.f32 %v323_v62, %v207_v63  ;;  %v409_v1 = vpop.f32.mrb[1].mxu1 }
 0x1b9   :  { %v211_v2 = vmax.f32 %v208_v0, 0.0 }
 0x1bb   :  { %443 = vmatmul.mubr.f32.vlgmr.msra.gmra.mrb[2].mxu0 %v211_v2 }
 0x28e   :  { %v301_v4 = vpop.f32.mrb[2].mxu0 }
 0x28f   :  { %v302_v5 = vadd.f32 %v324_v3, %v301_v4  ;;  %v444_v6 = vpop.f32.mrb[3].mxu0 }
 0x291   :  { %305 = vst [vmem:[#allocation2] sm:$0xff] %v302_v5 }
 0x292   :  { %516 = shalt.err (!%p513_p4)
}
 0x293   :  { %s517_s29 = scalar_lea.hbm %s735_s7, 128 }
 0x294   :  { %p518_p5 = scmp.ne.s32.totalorder %s735_s7, %s517_s29  ;;  %p521_p6 = scmp.lt.u32.totalorder %s517_s29, %s735_s7 }
 0x296   :  { %p523_p7 = pnand %p521_p6, %p518_p5 }
 0x298   :  { %526 = shalt.err (!%p523_p7)
}
 0x299   :  { %315 = dma.vmem_to_hbm [thread:$0]  %s313_s27, 128, %s735_s7, [#allocation3]  }
 0x29a   :  { %527 = dma.done.wait [#allocation3], 128  }
 0x29b   :  { %528 = vsyncadd [#allocation3], 4294967168 }
 0x29c   :  { %319 = vsyncpa [#allocation3], 1 }

</bundles_post_ra>
